<compile_context>
chip_gen: v6e
topology: v6e:2x2x1
jax: 0.10.0
libtpu: 0.0.40
codegen_flags: <defaults>
</compile_context>

<pallas_src>
import functools

import jax
import jax.numpy as jnp
from jax.experimental import pallas as pl
from jax.experimental.pallas import tpu as pltpu


def _round_up(n, m):
    return (n + m - 1) // m * m


def _vmem_capacity_bytes():
    """Per-core VMEM capacity (conservative 64 MiB fallback = v7x per-TC)."""
    try:
        info = pltpu.get_tpu_info()
        for attr in ("vmem_capacity_bytes", "vmem_bytes"):
            v = getattr(info, attr, None)
            if v:
                return int(v)
    except Exception:
        pass
    return 64 * 1024 * 1024


def _measurement_kernel(x_ref, w_ref, b_ref, o_ref):
    """One row tile of the fused dual-linear + elementwise product.

    x_ref: (tm_g, G*E)   compute dtype (bf16)
    w_ref: (G*E, 2*L)    compute dtype (block-diag fused weights)
    b_ref: (1, 2*L)      f32
    o_ref: (tm_g, L)     output dtype; split at L is a lane-block boundary
                         whenever L is a multiple of 128 (lane-dense path).
    """
    acc = jnp.dot(x_ref[...], w_ref[...], preferred_element_type=jnp.float32)
    acc = acc + b_ref[...]                                  # (tm_g, 2L) f32
    half = o_ref.shape[-1]
    o_ref[...] = (acc[:, :half] * acc[:, half:]).astype(o_ref.dtype)


@functools.partial(
    jax.jit,
    static_argnames=("tile_rows", "small_problem_bytes", "compute_dtype"),
)
def measurement_forward(
    x, w_m, b_m, w_mt, b_mt,
    *,
    tile_rows=None,
    small_problem_bytes=256 * 1024,
    compute_dtype=jnp.bfloat16,
):
    """x: (..., E);  w_*: (E, D) pre-transposed;  b_*: (D,).  Returns (..., D)."""
    orig_shape = x.shape
    E = orig_shape[-1]
    D = w_m.shape[1]
    x2d = x.reshape(-1, E)
    N = x2d.shape[0]

    out_dtype = x.dtype
    out_itemsize = jnp.dtype(out_dtype).itemsize

    # --- Small-problem fast path: plain XLA beats kernel launch overhead. ---
    if small_problem_bytes and N * (E + D) * out_itemsize < small_problem_bytes:
        out = (x2d @ w_m + b_m) * (x2d @ w_mt + b_mt)
        return out.reshape(*orig_shape[:-1], D)

    cd = jnp.dtype(compute_dtype) if compute_dtype is not None else jnp.dtype(x.dtype)
    cd_itemsize = cd.itemsize

    # --- Choose the row-group factor G for a lane-dense output. -------------
    # With G = 128 // D (when it divides evenly), G logical rows are packed
    # into one kernel row, the fused weight is block-diagonal, and both the
    # M/Mt split and the output store are 128-lane aligned.
    if D < 128 and 128 % D == 0:
        G = 128 // D
    else:
        G = 1           # D % 128 == 0 -> split free anyway; else masked tail.
    L = G * D           # lanes per half of the accumulator.

    # --- Build the fused (block-diagonal) weight and bias. -------------------
    if G == 1:
        w_fused = jnp.concatenate([w_m, w_mt], axis=1)              # (E, 2D)
        b_fused = jnp.concatenate([b_m, b_mt], axis=0)              # (2D,)
    else:
        eye = jnp.eye(G, dtype=w_m.dtype)
        w_fused = jnp.concatenate(
            [jnp.kron(eye, w_m), jnp.kron(eye, w_mt)], axis=1)      # (G*E, 2L)
        b_fused = jnp.concatenate([jnp.tile(b_m, G), jnp.tile(b_mt, G)], axis=0)
    w_fused = w_fused.astype(cd)
    b_fused = b_fused.astype(jnp.float32).reshape(1, 2 * L)

    x2d = x2d.astype(cd)

    # --- Adaptive row tile (in units of packed rows, tm_g). ------------------
    # Target ~2 MiB of streamed x+out bytes per grid step; keep tm_g a
    # multiple of 16 (bf16 sublane packing; also valid for f32).
    x_row_bytes = G * E * cd_itemsize
    out_row_bytes = L * out_itemsize
    w_bytes = (G * E) * (2 * L) * cd_itemsize
    b_bytes = 2 * L * 4

    def footprint(tmg):
        return (2 * tmg * x_row_bytes          # double-buffered x tiles
                + 2 * tmg * out_row_bytes      # double-buffered out tiles
                + tmg * 2 * L * 4              # f32 accumulator intermediate
                + w_bytes + b_bytes            # single-buffered constants
                + (1 << 20))                   # slack

    cap = _vmem_capacity_bytes()               # per-core (v7x: 64 MiB/TC)
    budget = max(16 * 1024 * 1024, int(cap * 0.45))

    target_step_bytes = 2 * 1024 * 1024
    rows_g_total = _round_up(-(-N // G), 16)
    if tile_rows is not None:
        tm_g = _round_up(max(1, int(tile_rows) // G), 16)
    else:
        tm_g = _round_up(max(1, target_step_bytes // max(1, x_row_bytes + out_row_bytes)), 16)
    tm_g = max(16, min(tm_g, 8192, rows_g_total))
    while tm_g > 16 and footprint(tm_g) > budget:          # fit per-core VMEM
        tm_g = _round_up(tm_g // 2, 16)
    while tm_g > 16 and (_round_up(N, tm_g * G) - N) * 8 > N:   # pad waste >12.5%
        tm_g = _round_up(tm_g // 2, 16)

    tm_eff = tm_g * G
    Np = _round_up(N, tm_eff)
    if Np != N:
        x2d = jnp.pad(x2d, ((0, Np - N), (0, 0)))

    # Free row-major repack: G consecutive rows share one kernel row.
    xg = x2d.reshape(Np // G, G * E)
    grid = (Np // tm_eff,)

    vmem_limit = min(max(int(footprint(tm_g)), 16 * 1024 * 1024),
                     int(cap) - (2 << 20))

    cost = pl.CostEstimate(
        flops=int(2 * (Np // G) * (G * E) * (2 * L) + 3 * Np * D),
        transcendentals=0,
        bytes_accessed=int((Np // G) * G * E * cd_itemsize
                           + (Np // G) * L * out_itemsize
                           + w_bytes + b_bytes),
    )

    out_g = pl.pallas_call(
        _measurement_kernel,
        out_shape=jax.ShapeDtypeStruct((Np // G, L), out_dtype),
        grid_spec=pltpu.PrefetchScalarGridSpec(
            num_scalar_prefetch=0,
            grid=grid,
            in_specs=[
                # Activation row tile (streamed, double-buffered by default).
                pl.BlockSpec((tm_g, G * E), lambda i: (i, 0)),
                # Fused weights / bias: constant index_map -> single-buffer.
                pl.BlockSpec((G * E, 2 * L), lambda i: (0, 0),
                             pipeline_mode=pl.Buffered(buffer_count=1)),
                pl.BlockSpec((1, 2 * L), lambda i: (0, 0),
                             pipeline_mode=pl.Buffered(buffer_count=1)),
            ],
            out_specs=pl.BlockSpec((tm_g, L), lambda i: (i, 0)),
        ),
        compiler_params=pltpu.CompilerParams(
            dimension_semantics=("parallel",),
            vmem_limit_bytes=vmem_limit,
        ),
        cost_estimate=cost,
    )(xg, w_fused, b_fused)

    out = out_g.reshape(Np, D)[:N]
    return out.reshape(*orig_shape[:-1], D)


if __name__ == "__main__":
    # Small shapes consistent with the module: batch=2, seq=8, emb_dim=32, output_dim=32.
    emb_dim, output_dim = 32, 32
    batch, seq = 2, 8

    key = jax.random.PRNGKey(0)
    kx, kw1, kb1, kw2, kb2 = jax.random.split(key, 5)

    x = jax.random.normal(kx, (batch, seq, emb_dim), dtype=jnp.float32)

    # Deterministic parameter init (mimics nn.Linear shapes: weight (D, E), bias (D,)).
    bound = 1.0 / (emb_dim ** 0.5)
    w_m_pt = jax.random.uniform(kw1, (output_dim, emb_dim), minval=-bound, maxval=bound)
    b_m = jax.random.uniform(kb1, (output_dim,), minval=-bound, maxval=bound)
    w_mt_pt = jax.random.uniform(kw2, (output_dim, emb_dim), minval=-bound, maxval=bound)
    b_mt = jax.random.uniform(kb2, (output_dim,), minval=-bound, maxval=bound)

    # Pre-transpose weights to (E, D) for the kernel's row-major matmul.
    w_m = w_m_pt.T
    w_mt = w_mt_pt.T

    # Force the Pallas path (the default wrapper would route this tiny problem
    # through the XLA fast path).
    out = measurement_forward(x, w_m, b_m, w_mt, b_mt, small_problem_bytes=0)
    out = jax.block_until_ready(out)
    assert out.shape == (batch, seq, output_dim)

    # Reference in matching bf16 input precision (accumulation stays f32).
    xb = x.astype(jnp.bfloat16).astype(jnp.float32)
    wmb = w_m.astype(jnp.bfloat16).astype(jnp.float32)
    wmtb = w_mt.astype(jnp.bfloat16).astype(jnp.float32)
    ref_bf16_in = (xb @ wmb + b_m) * (xb @ wmtb + b_mt)
    assert jnp.allclose(out, ref_bf16_in, atol=2e-3, rtol=2e-3), "mismatch vs bf16-input reference"

    # Loose check against the full-f32 reference (bf16 rounding of inputs only).
    ref_f32 = (x @ w_m + b_m) * (x @ w_mt + b_mt)
    assert jnp.allclose(out, ref_f32, atol=5e-2, rtol=5e-2), "mismatch vs f32 reference"

    # Also exercise the small-problem XLA fast path (default threshold).
    out_fast = jax.block_until_ready(measurement_forward(x, w_m, b_m, w_mt, b_mt))
    assert jnp.allclose(out_fast, ref_f32, atol=1e-4, rtol=1e-4), "fast path mismatch"

    print("KERNEL_OK")
</pallas_src>

<mosaic_0001>
module attributes {stable_mosaic.version = 11 : i64} {
  func.func @_measurement_kernel(%arg0: i32, %arg1: memref<16x128xbf16, #tpu.memory_space<vmem>>, %arg2: memref<128x256xbf16, #tpu.memory_space<vmem>>, %arg3: memref<1x256xf32, #tpu.memory_space<vmem>>, %arg4: memref<16x128xf32, #tpu.memory_space<vmem>>) attributes {dimension_semantics = [#tpu.dimension_semantics<parallel>], iteration_bounds = array<i64: 1>, scalar_prefetch = 0 : i64, scratch_operands = 0 : i64, tpu.core_type = #tpu.core_type<tc>, window_params = [{transform_indices = @transform_0, window_bounds = array<i64: 16, 128>}, {pipeline_mode = #tpu.pipeline_mode<synchronous>, transform_indices = @transform_1, window_bounds = array<i64: 128, 256>}, {pipeline_mode = #tpu.pipeline_mode<synchronous>, transform_indices = @transform_2, window_bounds = array<i64: 1, 256>}, {transform_indices = @transform_3, window_bounds = array<i64: 16, 128>}]} {
    %c0 = arith.constant 0 : index
    %c0_0 = arith.constant 0 : index
    %0 = vector.load %arg1[%c0, %c0_0] : memref<16x128xbf16, #tpu.memory_space<vmem>>, vector<16x128xbf16>
    %c0_1 = arith.constant 0 : index
    %c0_2 = arith.constant 0 : index
    %1 = vector.load %arg2[%c0_1, %c0_2] : memref<128x256xbf16, #tpu.memory_space<vmem>>, vector<128x256xbf16>
    %cst = arith.constant dense<0.000000e+00> : vector<16x256xf32>
    %2 = tpu.matmul %0, %1, %cst {dimension_numbers = #tpu.dot_dimension_numbers<[1], [0], [0], [1], [0, 0, 1, 1], [], []>} : vector<16x128xbf16>, vector<128x256xbf16>, vector<16x256xf32> -> vector<16x256xf32>
    %c0_3 = arith.constant 0 : index
    %c0_4 = arith.constant 0 : index
    %3 = vector.load %arg3[%c0_3, %c0_4] : memref<1x256xf32, #tpu.memory_space<vmem>>, vector<1x256xf32>
    %4 = vector.broadcast %3 : vector<1x256xf32> to vector<16x256xf32>
    %5 = arith.addf %2, %4 : vector<16x256xf32>
    %6 = vector.extract_strided_slice %5 {offsets = [0, 0], sizes = [16, 128], strides = [1, 1]} : vector<16x256xf32> to vector<16x128xf32>
    %7 = vector.extract_strided_slice %5 {offsets = [0, 128], sizes = [16, 128], strides = [1, 1]} : vector<16x256xf32> to vector<16x128xf32>
    %8 = arith.mulf %6, %7 : vector<16x128xf32>
    %c0_5 = arith.constant 0 : index
    %c0_6 = arith.constant 0 : index
    %9 = vector.load %arg4[%c0_5, %c0_6] : memref<16x128xf32, #tpu.memory_space<vmem>>, vector<16x128xf32>
    tpu.vector_store %arg4[%c0_5, %c0_6], %8 {strides = array<i32>} : memref<16x128xf32, #tpu.memory_space<vmem>>, vector<16x128xf32>,
    return
  }
  func.func @transform_0(%arg0: i32) -> (i32, i32) {
    %c0_i32 = arith.constant 0 : i32
    %c0_i32_0 = arith.constant 0 : i32
    return %arg0, %c0_i32 : i32, i32
  }
  func.func @transform_1(%arg0: i32) -> (i32, i32) {
    %c0_i32 = arith.constant 0 : i32
    %c0_i32_0 = arith.constant 0 : i32
    %c0_i32_1 = arith.constant 0 : i32
    return %c0_i32, %c0_i32_0 : i32, i32
  }
  func.func @transform_2(%arg0: i32) -> (i32, i32) {
    %c0_i32 = arith.constant 0 : i32
    %c0_i32_0 = arith.constant 0 : i32
    %c0_i32_1 = arith.constant 0 : i32
    return %c0_i32, %c0_i32_0 : i32, i32
  }
  func.func @transform_3(%arg0: i32) -> (i32, i32) {
    %c0_i32 = arith.constant 0 : i32
    %c0_i32_0 = arith.constant 0 : i32
    return %arg0, %c0_i32 : i32, i32
  }
}

</mosaic_0001>

<bundles_post_ra>
// kernel: tile.13
= control target key start
LH: loop header
LB: loop body
LE: loop exit
PB: predicated region body
PF: predicated region fallthrough
CT: control target
= control target key end

     0   :  { %s22_s0 = inlined_call_operand.vmem [shape: f32[32], index: 0, kind: input, shape index: {}]   ;;  %s23_s1 = inlined_call_operand.vmem [shape: f32[4,32], index: 1, kind: output, shape index: {}]  }
   0x1   :  { %v4_v0 = vld [vmem:[%s22_s0] ss:$0 sm:$0xff] }
   0x2   :  { %5 = vst [vmem:[%s23_s1] sm:$0xf] %v4_v0 }

// kernel: tile.14
= control target key start
LH: loop header
LB: loop body
LE: loop exit
PB: predicated region body
PF: predicated region fallthrough
CT: control target
= control target key end

     0   :  { %vm8_vm0 = vcmask 261120   ;;  %s40_s8 = smov 32   ;;  %s41_s9 = smov 64   ;;  %vm14_vm1 = vcmask 1048320   ;;  %vm20_vm2 = vcmask 785920   ;;  %vm26_vm3 = vcmask 523520   ;;  %s58_s0 = inlined_call_operand.vmem [shape: f32[4,32], index: 0, kind: input, shape index: {}]   ;;  %s59_s1 = inlined_call_operand.vmem [shape: f32[128], index: 1, kind: output, shape index: {}]  }
   0x1   :  { %v5_v0 = vld [vmem:[%s58_s0] sm:$0xf]  ;;  %s39_s0 = smov 96  }
   0x2   :  { %6 = vst [vmem:[#allocation1] sm:$0xf] %v5_v0 }
   0x9   :  { %v11_v1 = vld [vmem:[#allocation1 + $0x3] sm:$0x1]   ;;  %v23_v2 = vld [vmem:[#allocation1 + $0x1] sm:$0x1]   ;;  %v7_v3 = vld [vmem:[#allocation1] sm:$0x1]  }
   0xa   :  { %12 = vrot.lane.b32.xlu0 %v11_v1, %s39_s0  ;;  %24 = vrot.lane.b32.xlu1 %v23_v2, %s40_s8  ;;  %v17_v4 = vld [vmem:[#allocation1 + $0x2] sm:$0x1]   ;;  %9 = vst.msk [vmem:[#allocation0] sm:$0x1] %vm8_vm0, %v7_v3  }
   0xe   :  { %18 = vrot.lane.b32.xlu0 %v17_v4, %s41_s9 }
  0x7c   :  { %v13_v5 = vpop.permute.xlu0 %12   ;;  %v25_v6 = vpop.permute.xlu1 %24  }
  0x7d   :  { %15 = vst.msk [vmem:[#allocation0] sm:$0x1] %vm14_vm1, %v13_v5  }
  0x80   :  { %v19_v7 = vpop.permute.xlu0 %18  }
  0x81   :  { %21 = vst.msk [vmem:[#allocation0] sm:$0x1] %vm20_vm2, %v19_v7  }
  0x82   :  { %27 = vst.msk [vmem:[#allocation0] sm:$0x1] %vm26_vm3, %v25_v6  }
  0x89   :  { %v32_v8 = vld [vmem:[#allocation0] sm:$0x1] }
  0x8a   :  { %35 = vst [vmem:[%s59_s1] sm:$0x1] %v32_v8 }

// kernel: measurement_forward.1
= control target key start
LH: loop header
LB: loop body
LE: loop exit
PB: predicated region body
PF: predicated region fallthrough
CT: control target
= control target key end

     0   :  { %v225_v1 = vmov 0   ;;  %v35_v18 = vlaneseq  ;;  %s306_s1 = inlined_call_operand.vmem [shape: bf16[128,256], index: 1, kind: input, shape index: {}]   ;;  %s307_s0 = inlined_call_operand.vmem [shape: bf16[16,128], index: 0, kind: input, shape index: {}]   ;;  %s308_s2 = inlined_call_operand.vmem [shape: f32[1,256], index: 2, kind: input, shape index: {}]   ;;  %s309_s3 = inlined_call_operand.vmem [shape: f32[16,128], index: 3, kind: output, shape index: {}]  }
   0x1   :  { %v200_v0 = vld [vmem:[%s306_s1 + $0x74] ss:$8 sps:$4 sm:$0xff]   ;;  %163 = vmatprep.mubr.bf16.mxu0 %v225_v1  ;;  %v202_v2 = vld [vmem:[%s306_s1 + $0x70] ss:$8 sps:$4 sm:$0xff]   ;;  %v203_v3 = vld [vmem:[%s306_s1 + $0x64] ss:$8 sps:$4 sm:$0xff]  }
   0x2   :  { %131 = vmatprep.subr.bf16.mxu0 %v200_v0  ;;  %v205_v4 = vld [vmem:[%s306_s1 + $0x60] ss:$8 sps:$4 sm:$0xff]   ;;  %v206_v5 = vld [vmem:[%s306_s1 + $0x54] ss:$8 sps:$4 sm:$0xff]   ;;  %v208_v6 = vld [vmem:[%s306_s1 + $0x50] ss:$8 sps:$4 sm:$0xff]  }
   0x3   :  { %132 = vmatpush1.bf16.msra.mxu0 %v202_v2  ;;  %v209_v7 = vld [vmem:[%s306_s1 + $0x44] ss:$8 sps:$4 sm:$0xff]   ;;  %v211_v8 = vld [vmem:[%s306_s1 + $0x40] ss:$8 sps:$4 sm:$0xff]   ;;  %v212_v9 = vld [vmem:[%s306_s1 + $0x34] ss:$8 sps:$4 sm:$0xff]  }
   0x4   :  { %133 = vmatprep.subr.bf16.mxu0 %v203_v3  ;;  %v214_v10 = vld [vmem:[%s306_s1 + $0x30] ss:$8 sps:$4 sm:$0xff]   ;;  %v215_v11 = vld [vmem:[%s306_s1 + $0x24] ss:$8 sps:$4 sm:$0xff]   ;;  %v217_v12 = vld [vmem:[%s306_s1 + $0x20] ss:$8 sps:$4 sm:$0xff]  }
   0x5   :  { %v218_v13 = vld [vmem:[%s306_s1 + $0x14] ss:$8 sps:$4 sm:$0xff]   ;;  %v220_v14 = vld [vmem:[%s306_s1 + $0x10] ss:$8 sps:$4 sm:$0xff]   ;;  %v221_v15 = vld [vmem:[%s306_s1 + $0x4] ss:$8 sps:$4 sm:$0xff]  }
   0x6   :  { %v223_v16 = vld [vmem:[%s306_s1] ss:$8 sps:$4 sm:$0xff]   ;;  %v36_v19 = vshrl.u32 %v35_v18, 7 }
   0x7   :  { %134 = vmatpush1.bf16.msra.mxu0 %v205_v4  ;;  %v224_v17 = vld [vmem:[%s307_s0] sm:$0xff]  }
   0x8   :  { %135 = vmatprep.subr.bf16.mxu0 %v206_v5  ;;  %v37_v20 = vsub.s32 0, %v36_v19  ;;  %v41_v21 = vsub.s32 1, %v36_v19  ;;  %v33_v22 = vld [vmem:[%s308_s2] sm:$0x3] }
   0xa   :  { %v38_v23 = vrot.slane %v33_v22, %v37_v20  ;;  %v42_v24 = vrot.slane %v33_v22, %v41_v21 }
   0xb   :  { %136 = vmatpush1.bf16.msra.mxu0 %v208_v6 }
   0xc   :  { %137 = vmatprep.subr.bf16.mxu0 %v209_v7 }
   0xf   :  { %138 = vmatpush1.bf16.msra.mxu0 %v211_v8 }
  0x10   :  { %139 = vmatprep.subr.bf16.mxu0 %v212_v9 }
  0x13   :  { %140 = vmatpush1.bf16.msra.mxu0 %v214_v10 }
  0x14   :  { %141 = vmatprep.subr.bf16.mxu0 %v215_v11 }
  0x17   :  { %142 = vmatpush1.bf16.msra.mxu0 %v217_v12 }
  0x18   :  { %143 = vmatprep.subr.bf16.mxu0 %v218_v13 }
  0x1b   :  { %144 = vmatpush1.bf16.msra.mxu0 %v220_v14 }
  0x1c   :  { %145 = vmatprep.subr.bf16.mxu0 %v221_v15 }
  0x1f   :  { %146 = vmatpush1.bf16.msra.mxu0 %v223_v16 }
  0x22   :  { %164 = vmatmul.mubr.bf16.vlgmr.msra.gmra.mxu0 %v224_v17 }
  0xe2   :  { %v165_v25 = vpop.f32.mrf.mxu0 }
  0xe3   :  { %v166_v27 = vadd.f32 %v165_v25, %v38_v23 }
  0xe4   :  { %v167_v26 = vpop.f32.mrf.mxu0 }
  0xe5   :  { %v168_v28 = vadd.f32 %v167_v26, %v42_v24 }
  0xe6   :  { %v169_v29 = vpop.f32.mrf.mxu0 }
  0xe7   :  { %v174_v30 = vmul.f32 %v168_v28, %v166_v27  ;;  %v170_v32 = vadd.f32 %v169_v29, %v38_v23 }
  0xe8   :  { %v171_v31 = vpop.f32.mrf.mxu0 }
  0xe9   :  { %176 = vst [vmem:[%s309_s3] sm:$0xff] %v174_v30  ;;  %v172_v33 = vadd.f32 %v171_v31, %v42_v24 }
  0xeb   :  { %v175_v34 = vmul.f32 %v172_v33, %v170_v32 }
  0xed   :  { %177 = vst [vmem:[%s309_s3 + $0x8] sm:$0xff] %v175_v34 }

</bundles_post_ra>
